<compile_context>
chip_gen: v7x
topology: tpu7x:2x2x1
jax: 0.10.0
libtpu: 0.0.40
codegen_flags: <defaults>
</compile_context>

<pallas_src>
import functools

import jax
import jax.numpy as jnp
from jax.experimental import pallas as pl
from jax.experimental.pallas import tpu as pltpu

_LANE = 128                      # TPU vreg lane width
_SUBLANE = 8                     # f32 sublane tiling
_SAMPLES_PER_ROW = _LANE // 2    # 64 samples per 128-lane row (2 features each)


def _mlp_kernel(p_ref, x_ref, o_ref):
    """relu(x @ W1^T + b1) @ W2^T + b2 on an interleaved-lane tile.

    p_ref : SMEM f32[12] = [w1_00,w1_01,w1_10,w1_11, b1_0,b1_1,
                            w2_00,w2_01,w2_10,w2_11, b2_0,b2_1]
    x_ref : VMEM (tile_rows, 128) f32; lane 2k holds feature 0 of a sample,
            lane 2k+1 holds feature 1 of the same sample.
    o_ref : VMEM (tile_rows, 128) f32; lane 2k = logit 0, lane 2k+1 = logit 1.
    """
    x = x_ref[...]

    w1_00, w1_01, w1_10, w1_11 = p_ref[0], p_ref[1], p_ref[2], p_ref[3]
    b1_0, b1_1 = p_ref[4], p_ref[5]
    w2_00, w2_01, w2_10, w2_11 = p_ref[6], p_ref[7], p_ref[8], p_ref[9]
    b2_0, b2_1 = p_ref[10], p_ref[11]

    # (1, 128) lane-parity mask; broadcasts over sublanes for free.
    lane = jax.lax.broadcasted_iota(jnp.int32, (1, x.shape[1]), 1)
    even = (lane & 1) == 0

    # Partner feature for every lane (adjacent-pair swap): even lanes read
    # lane+1, odd lanes read lane-1.  np.roll semantics; shift 127 == -1 mod
    # 128.  Both rolls land on the XLU slot, off the VALU/load critical path.
    x_part = jnp.where(even, pltpu.roll(x, 127, 1), pltpu.roll(x, 1, 1))

    # Lane-alternating layer-1 weights so (x, x_part) acts as (x0, x1) on
    # every lane.  These are (1, 128) vectors built once per grid step.
    h0_ws = jnp.where(even, w1_00, w1_01)
    h0_wp = jnp.where(even, w1_01, w1_00)
    h1_ws = jnp.where(even, w1_10, w1_11)
    h1_wp = jnp.where(even, w1_11, w1_10)

    # fc1 + ReLU: pure VPU broadcast multiply-adds on fully dense vregs.
    h0 = jnp.maximum(x * h0_ws + x_part * h0_wp + b1_0, 0.0)
    h1 = jnp.maximum(x * h1_ws + x_part * h1_wp + b1_1, 0.0)

    # fc2: even lanes emit logit 0, odd lanes logit 1 -> output stays
    # interleaved, so the wrapper's reshape back to (B, 2) is a no-copy view.
    o_w0 = jnp.where(even, w2_00, w2_10)
    o_w1 = jnp.where(even, w2_01, w2_11)
    o_b = jnp.where(even, b2_0, b2_1)

    o_ref[...] = h0 * o_w0 + h1 * o_w1 + o_b  # single full-width unmasked store


@functools.partial(jax.jit, static_argnames=("tile_rows",))
def basic_classifier_forward(x, w1, b1, w2, b2, *, tile_rows=8192):
    """y = relu(x @ W1^T + b1) @ W2^T + b2  (PyTorch nn.Linear semantics).

    x: (B, 2) f32; w1, w2: (2, 2) stored as (out_features, in_features);
    b1, b2: (2,).  Returns (B, 2) f32.
    """
    B = x.shape[0]
    x = x.astype(jnp.float32)

    # Interleaved lane layout: row-major (B, 2) -> (rows, 128) is a pure
    # reshape (no transpose, no relayout).
    rows = pl.cdiv(B, _SAMPLES_PER_ROW)
    rows = pl.cdiv(rows, _SUBLANE) * _SUBLANE            # sublane-align rows
    # Clamp the tile to the actual problem so small batches don't over-pad and
    # tile_rows stays a multiple of 8 (keeps blocks (8,128)-aligned).
    tile_rows = max(_SUBLANE, (min(tile_rows, rows) // _SUBLANE) * _SUBLANE)
    rows_pad = pl.cdiv(rows, tile_rows) * tile_rows
    b_pad = rows_pad * _SAMPLES_PER_ROW

    if b_pad != B:
        # Only the tail tile is padded; padded samples are sliced off below.
        x = jnp.pad(x, ((0, b_pad - B), (0, 0)))
    x_lanes = x.reshape(rows_pad, _LANE)                 # free reshape

    # Pack all 12 parameters into a single SMEM-resident vector.
    params = jnp.concatenate(
        [w1.reshape(-1), b1.reshape(-1), w2.reshape(-1), b2.reshape(-1)]
    ).astype(jnp.float32)

    out = pl.pallas_call(
        _mlp_kernel,
        out_shape=jax.ShapeDtypeStruct((rows_pad, _LANE), jnp.float32),
        grid_spec=pl.GridSpec(
            grid=(rows_pad // tile_rows,),
            in_specs=[
                pl.BlockSpec(memory_space=pltpu.MemorySpace.SMEM),   # params
                pl.BlockSpec((tile_rows, _LANE), lambda i: (i, 0)),  # x tile
            ],
            out_specs=pl.BlockSpec((tile_rows, _LANE), lambda i: (i, 0)),
        ),
        compiler_params=pltpu.CompilerParams(
            dimension_semantics=("parallel",),       # shards steps on v7x 2xTC
            vmem_limit_bytes=48 * 1024 * 1024,       # headroom for 16 MiB of
        ),                                           # double-buffered tiles
    )(params, x_lanes)

    # Free reshape back to (B, 2); padded tail samples are dropped.
    return out.reshape(b_pad, 2)[:B]


def _init_params(key):
    # Deterministic init mimicking PyTorch's default Linear init:
    # U(-1/sqrt(fan_in), 1/sqrt(fan_in)) with fan_in = 2.
    k1, k2, k3, k4 = jax.random.split(key, 4)
    bound = 1.0 / jnp.sqrt(2.0)
    w1 = jax.random.uniform(k1, (2, 2), jnp.float32, -bound, bound)
    b1 = jax.random.uniform(k2, (2,), jnp.float32, -bound, bound)
    w2 = jax.random.uniform(k3, (2, 2), jnp.float32, -bound, bound)
    b2 = jax.random.uniform(k4, (2,), jnp.float32, -bound, bound)
    return w1, b1, w2, b2


if __name__ == "__main__":
    key = jax.random.PRNGKey(0)
    k_params, k_x = jax.random.split(key)

    w1, b1, w2, b2 = _init_params(k_params)
    batch = 200  # deliberately not a multiple of 64: exercises pad + tail slice
    x = jax.random.normal(k_x, (batch, 2), jnp.float32)

    out = jax.block_until_ready(basic_classifier_forward(x, w1, b1, w2, b2))

    # Reference check in plain JAX (same math as the PyTorch module).
    ref = jnp.maximum(x @ w1.T + b1, 0.0) @ w2.T + b2
    assert out.shape == (batch, 2)
    assert jnp.allclose(out, ref, atol=1e-5, rtol=1e-5)

    print("KERNEL_OK")
</pallas_src>

<mosaic_0001>
module attributes {stable_mosaic.version = 11 : i64} {
  func.func @_mlp_kernel(%arg0: i32, %arg1: memref<12xf32, #tpu.memory_space<smem>>, %arg2: memref<8x128xf32, #tpu.memory_space<vmem>>, %arg3: memref<8x128xf32, #tpu.memory_space<vmem>>) attributes {dimension_semantics = [#tpu.dimension_semantics<parallel>], iteration_bounds = array<i64: 1>, scalar_prefetch = 0 : i64, scratch_operands = 0 : i64, tpu.core_type = #tpu.core_type<tc>, window_params = [{transform_indices = @transform_0, window_bounds = array<i64: 12>}, {transform_indices = @transform_1, window_bounds = array<i64: 8, 128>}, {transform_indices = @transform_2, window_bounds = array<i64: 8, 128>}]} {
    %c0 = arith.constant 0 : index
    %c0_0 = arith.constant 0 : index
    %0 = vector.load %arg2[%c0, %c0_0] : memref<8x128xf32, #tpu.memory_space<vmem>>, vector<8x128xf32>
    %c0_1 = arith.constant 0 : index
    %1 = memref.load %arg1[%c0_1] : memref<12xf32, #tpu.memory_space<smem>>
    %c1 = arith.constant 1 : index
    %2 = memref.load %arg1[%c1] : memref<12xf32, #tpu.memory_space<smem>>
    %c2 = arith.constant 2 : index
    %3 = memref.load %arg1[%c2] : memref<12xf32, #tpu.memory_space<smem>>
    %c3 = arith.constant 3 : index
    %4 = memref.load %arg1[%c3] : memref<12xf32, #tpu.memory_space<smem>>
    %c4 = arith.constant 4 : index
    %5 = memref.load %arg1[%c4] : memref<12xf32, #tpu.memory_space<smem>>
    %c5 = arith.constant 5 : index
    %6 = memref.load %arg1[%c5] : memref<12xf32, #tpu.memory_space<smem>>
    %c6 = arith.constant 6 : index
    %7 = memref.load %arg1[%c6] : memref<12xf32, #tpu.memory_space<smem>>
    %c7 = arith.constant 7 : index
    %8 = memref.load %arg1[%c7] : memref<12xf32, #tpu.memory_space<smem>>
    %c8 = arith.constant 8 : index
    %9 = memref.load %arg1[%c8] : memref<12xf32, #tpu.memory_space<smem>>
    %c9 = arith.constant 9 : index
    %10 = memref.load %arg1[%c9] : memref<12xf32, #tpu.memory_space<smem>>
    %c10 = arith.constant 10 : index
    %11 = memref.load %arg1[%c10] : memref<12xf32, #tpu.memory_space<smem>>
    %c11 = arith.constant 11 : index
    %12 = memref.load %arg1[%c11] : memref<12xf32, #tpu.memory_space<smem>>
    %13 = tpu.iota {dimensions = array<i32: 1>} : vector<1x128xi32>
    %c1_i32 = arith.constant 1 : i32
    %14 = vector.broadcast %c1_i32 : i32 to vector<1x128xi32>
    %15 = arith.andi %13, %14 : vector<1x128xi32>
    %c0_i32 = arith.constant 0 : i32
    %16 = vector.broadcast %c0_i32 : i32 to vector<1x128xi32>
    %17 = arith.cmpi eq, %15, %16 : vector<1x128xi32>
    %c127_i32 = arith.constant 127 : i32
    %18 = tpu.dynamic_rotate %0 by %c127_i32 dim 1 : vector<8x128xf32>, i32 -> vector<8x128xf32>
    %c1_i32_2 = arith.constant 1 : i32
    %19 = tpu.dynamic_rotate %0 by %c1_i32_2 dim 1 : vector<8x128xf32>, i32 -> vector<8x128xf32>
    %20 = vector.shape_cast %17 : vector<1x128xi1> to vector<1x128xi1>
    %21 = vector.broadcast %20 : vector<1x128xi1> to vector<8x128xi1>
    %22 = arith.select %21, %18, %19 : vector<8x128xi1>, vector<8x128xf32>
    %23 = vector.broadcast %1 : f32 to vector<1x128xf32>
    %24 = vector.broadcast %2 : f32 to vector<1x128xf32>
    %25 = arith.select %17, %23, %24 : vector<1x128xi1>, vector<1x128xf32>
    %26 = vector.broadcast %2 : f32 to vector<1x128xf32>
    %27 = vector.broadcast %1 : f32 to vector<1x128xf32>
    %28 = arith.select %17, %26, %27 : vector<1x128xi1>, vector<1x128xf32>
    %29 = vector.broadcast %3 : f32 to vector<1x128xf32>
    %30 = vector.broadcast %4 : f32 to vector<1x128xf32>
    %31 = arith.select %17, %29, %30 : vector<1x128xi1>, vector<1x128xf32>
    %32 = vector.broadcast %4 : f32 to vector<1x128xf32>
    %33 = vector.broadcast %3 : f32 to vector<1x128xf32>
    %34 = arith.select %17, %32, %33 : vector<1x128xi1>, vector<1x128xf32>
    %35 = vector.broadcast %25 : vector<1x128xf32> to vector<8x128xf32>
    %36 = arith.mulf %0, %35 : vector<8x128xf32>
    %37 = vector.broadcast %28 : vector<1x128xf32> to vector<8x128xf32>
    %38 = arith.mulf %22, %37 : vector<8x128xf32>
    %39 = arith.addf %36, %38 : vector<8x128xf32>
    %40 = vector.broadcast %5 : f32 to vector<8x128xf32>
    %41 = arith.addf %39, %40 : vector<8x128xf32>
    %cst = arith.constant 0.000000e+00 : f32
    %42 = vector.broadcast %cst : f32 to vector<8x128xf32>
    %43 = arith.maximumf %41, %42 : vector<8x128xf32>
    %44 = vector.broadcast %31 : vector<1x128xf32> to vector<8x128xf32>
    %45 = arith.mulf %0, %44 : vector<8x128xf32>
    %46 = vector.broadcast %34 : vector<1x128xf32> to vector<8x128xf32>
    %47 = arith.mulf %22, %46 : vector<8x128xf32>
    %48 = arith.addf %45, %47 : vector<8x128xf32>
    %49 = vector.broadcast %6 : f32 to vector<8x128xf32>
    %50 = arith.addf %48, %49 : vector<8x128xf32>
    %cst_3 = arith.constant 0.000000e+00 : f32
    %51 = vector.broadcast %cst_3 : f32 to vector<8x128xf32>
    %52 = arith.maximumf %50, %51 : vector<8x128xf32>
    %53 = vector.broadcast %7 : f32 to vector<1x128xf32>
    %54 = vector.broadcast %9 : f32 to vector<1x128xf32>
    %55 = arith.select %17, %53, %54 : vector<1x128xi1>, vector<1x128xf32>
    %56 = vector.broadcast %8 : f32 to vector<1x128xf32>
    %57 = vector.broadcast %10 : f32 to vector<1x128xf32>
    %58 = arith.select %17, %56, %57 : vector<1x128xi1>, vector<1x128xf32>
    %59 = vector.broadcast %11 : f32 to vector<1x128xf32>
    %60 = vector.broadcast %12 : f32 to vector<1x128xf32>
    %61 = arith.select %17, %59, %60 : vector<1x128xi1>, vector<1x128xf32>
    %62 = vector.broadcast %55 : vector<1x128xf32> to vector<8x128xf32>
    %63 = arith.mulf %43, %62 : vector<8x128xf32>
    %64 = vector.broadcast %58 : vector<1x128xf32> to vector<8x128xf32>
    %65 = arith.mulf %52, %64 : vector<8x128xf32>
    %66 = arith.addf %63, %65 : vector<8x128xf32>
    %67 = vector.broadcast %61 : vector<1x128xf32> to vector<8x128xf32>
    %68 = arith.addf %66, %67 : vector<8x128xf32>
    %c0_4 = arith.constant 0 : index
    %c0_5 = arith.constant 0 : index
    %69 = vector.load %arg3[%c0_4, %c0_5] : memref<8x128xf32, #tpu.memory_space<vmem>>, vector<8x128xf32>
    tpu.vector_store %arg3[%c0_4, %c0_5], %68 {strides = array<i32>} : memref<8x128xf32, #tpu.memory_space<vmem>>, vector<8x128xf32>,
    return
  }
  func.func @transform_0(%arg0: i32) -> i32 {
    %c0_i32 = arith.constant 0 : i32
    %c0_i32_0 = arith.constant 0 : i32
    return %c0_i32 : i32
  }
  func.func @transform_1(%arg0: i32) -> (i32, i32) {
    %c0_i32 = arith.constant 0 : i32
    %c0_i32_0 = arith.constant 0 : i32
    return %arg0, %c0_i32 : i32, i32
  }
  func.func @transform_2(%arg0: i32) -> (i32, i32) {
    %c0_i32 = arith.constant 0 : i32
    %c0_i32_0 = arith.constant 0 : i32
    return %arg0, %c0_i32 : i32, i32
  }
}

</mosaic_0001>

<bundles_post_ra>
// kernel: basic_classifier_forward.1
= control target key start
LH: loop header
LB: loop body
LE: loop exit
PB: predicated region body
PF: predicated region fallthrough
CT: control target
= control target key end

     0   :  { %7 = vsyncpa [#allocation3], 0  ;;  %s168_s0 = inlined_call_operand.vmem [shape: f32[12], index: 0, kind: input, shape index: {}]   ;;  %s169_s1 = inlined_call_operand.vmem [shape: f32[8,128], index: 1, kind: input, shape index: {}]   ;;  %s170_s2 = inlined_call_operand.vmem [shape: f32[8,128], index: 2, kind: output, shape index: {}]  }
   0x1   :  { %s14_s11 = sshll.u32 %s168_s0, 4  ;;  %s15_s11 = int_to_ptr.vmem [resolvable:$true] %s14_s11 }
   0x2   :  { %s101_s12 = scalar_lea.vmem %s15_s11, 16  ;;  %p106_p1 = scmp.lt.s32.totalorder %s15_s11, %s15_s11 }
   0x3   :  { %p102_p0 = scmp.ne.s32.totalorder %s15_s11, %s101_s12  ;;  %p107_p2 = scmp.lt.s32.totalorder %s101_s12, %s101_s12 }
   0x5   :  { %p108_p3 = por %p107_p2, %p106_p1 }
   0x7   :  { %p109_p4 = pnand %p108_p3, %p102_p0 }
   0x9   :  { %112 = shalt.err (!%p109_p4)
}
   0xa   :  { %s115_s13 = smov [#allocation2]  }
   0xb   :  { %17 = dma.vmem_to_smem %s15_s11, 16, %s115_s13, [#allocation3]  }
   0xc   :  { %113 = dma.done.wait [#allocation3], 16  }
   0xd   :  { %114 = vsyncadd [#allocation3], 4294967280 }
   0xe   :  { %23 = sfence }
   0xf   :  { %v24_v0 = vld [vmem:[%s169_s1] sm:$0xff]  ;;  %s116_s16 = smov 127   ;;  %s117_s0 = smov 1   ;;  %v37_v1 = vlaneseq }
  0x10   :  { %41 = vrot.lane.b32.xlu0 %v24_v0, %s116_s16  ;;  %s25_s17 = sld [smem:[#allocation2]]  ;;  %s87_s18 = sld [smem:[#allocation2 + $0x1]] }
  0x11   :  { %v38_v2 = vand.u32 127, %v37_v1  ;;  %s88_s19 = sld [smem:[#allocation2 + $0x2]]  ;;  %s89_s20 = sld [smem:[#allocation2 + $0x3]] }
  0x12   :  { %s143_s21 = sld [smem:[#allocation2 + $0x4]]  ;;  %s145_s22 = sld [smem:[#allocation2 + $0x5]] }
  0x13   :  { %v39_v3 = vand.u32 1, %v38_v2  ;;  %s92_s1 = sld [smem:[#allocation2 + $0x6]]  ;;  %s93_s23 = sld [smem:[#allocation2 + $0x7]] }
  0x14   :  { %43 = vrot.lane.b32.xlu0 %v24_v0, %s117_s0  ;;  %s94_s24 = sld [smem:[#allocation2 + $0x8]]  ;;  %s95_s25 = sld [smem:[#allocation2 + $0x9]] }
  0x15   :  { %vm139_vm0 = vcmp.eq.s32.totalorder %v39_v3, 0  ;;  %s96_s26 = sld [smem:[#allocation2 + $0xa]]  ;;  %s97_s27 = sld [smem:[#allocation2 + $0xb]] }
  0x16   :  { %v48_v5 = vstv %s25_s17  ;;  %v49_v6 = vstv %s87_s18 }
  0x17   :  { %v52_v7 = vstv %s88_s19  ;;  %v53_v8 = vstv %s89_s20  ;;  %v50_v10 = vsel %vm139_vm0, %v48_v5, %v49_v6  ;;  %v51_v12 = vsel %vm139_vm0, %v49_v6, %v48_v5 }
  0x18   :  { %v54_v11 = vsel %vm139_vm0, %v52_v7, %v53_v8  ;;  %v55_v13 = vsel %vm139_vm0, %v53_v8, %v52_v7  ;;  %v56_v15 = vmul.f32 %v50_v10, %v24_v0  ;;  %v59_v20 = vstv %s143_s21 }
  0x19   :  { %v62_v16 = vmul.f32 %v54_v11, %v24_v0  ;;  %v65_v21 = vstv %s145_s22  ;;  %v68_v22 = vstv %s92_s1  ;;  %v71_v23 = vstv %s93_s23 }
  0x1a   :  { %v69_v24 = vstv %s94_s24  ;;  %v72_v25 = vstv %s95_s25 }
  0x1b   :  { %v70_v30 = vsel %vm139_vm0, %v68_v22, %v69_v24  ;;  %v73_v31 = vsel %vm139_vm0, %v71_v23, %v72_v25  ;;  %v74_v32 = vstv %s96_s26  ;;  %v75_v33 = vstv %s97_s27 }
  0x1c   :  { %v76_v38 = vsel %vm139_vm0, %v74_v32, %v75_v33 }
  0x82   :  { %v42_v9 = vpop.permute.xlu0 %41 }
  0x86   :  { %v44_v14 = vpop.permute.xlu0 %43 }
  0x87   :  { %v47_v17 = vsel %vm139_vm0, %v42_v9, %v44_v14 }
  0x88   :  { %v57_v18 = vmul.f32 %v51_v12, %v47_v17  ;;  %v63_v19 = vmul.f32 %v55_v13, %v47_v17 }
  0x8a   :  { %v58_v26 = vadd.f32 %v57_v18, %v56_v15  ;;  %v64_v27 = vadd.f32 %v63_v19, %v62_v16 }
  0x8c   :  { %v60_v28 = vadd.f32 %v59_v20, %v58_v26  ;;  %v66_v29 = vadd.f32 %v65_v21, %v64_v27 }
  0x8e   :  { %v61_v34 = vmax.f32 %v60_v28, 0.0  ;;  %v67_v35 = vmax.f32 %v66_v29, 0.0 }
  0x90   :  { %v77_v36 = vmul.f32 %v70_v30, %v61_v34  ;;  %v78_v37 = vmul.f32 %v73_v31, %v67_v35 }
  0x92   :  { %v79_v39 = vadd.f32 %v78_v37, %v77_v36 }
  0x94   :  { %v80_v40 = vadd.f32 %v79_v39, %v76_v38 }
  0x96   :  { %81 = vst [vmem:[%s170_s2] sm:$0xff] %v80_v40 }
  0x97   :  { %86 = vsyncpa [#allocation3], 1 }

</bundles_post_ra>
